<compile_context>
chip_gen: v5e
topology: v5e:2x2
jax: 0.10.0
libtpu: 0.0.40
codegen_flags: <defaults>
</compile_context>

<pallas_src>
import numpy as np
import jax
import jax.numpy as jnp
from jax.experimental import pallas as pl
from jax.experimental.pallas import tpu as pltpu

NUM_LEVELS = 3  # matches `num_levels = 3` in the PyTorch script


def _level_sizes(h, w, i):
    """Kernel / output sizes of F.avg_pool2d(kernel=stride=h // 2**i)."""
    k = h // (2 ** i)          # torch derives the kernel from h for both dims
    oh = (h - k) // k + 1
    ow = (w - k) // k + 1
    return k, oh, ow


def _build_pooling_matrix(h, w, num_levels, hw_pad):
    """(hw_pad, L) f32 constant: column j = 1/k^2 over pixels of pooled cell j."""
    cols, sizes = [], []
    for i in range(num_levels):
        k, oh, ow = _level_sizes(h, w, i)
        # Guard torch-semantics faithfulness: every level must produce at least
        # one cell; trailing rows/cols not covered by k are dropped, exactly as
        # torch's avg_pool2d (ceil_mode=False) and the reference below do.
        assert k >= 1 and oh >= 1 and ow >= 1, (
            "SPP level would produce an empty pooled map; check input size")
        sizes.append(oh * ow)
        inv = 1.0 / float(k * k)
        for a in range(oh):
            for b in range(ow):
                m = np.zeros((h, w), dtype=np.float32)
                m[a * k:(a + 1) * k, b * k:(b + 1) * k] = inv
                cols.append(m.reshape(-1))
    p = np.stack(cols, axis=1)                       # (h*w, L)
    if hw_pad > h * w:
        p = np.pad(p, ((0, hw_pad - h * w), (0, 0)))  # zero rows for padded lanes
    return p, sizes


def _make_spp_kernel(precision):
    def kernel(x_ref, p_ref, o_ref):
        # (tm, hw_pad) @ (hw_pad, L) on the MXU, f32 accumulation, one store.
        # Operands stay in their native dtype (no VPU upcast pass).
        o_ref[...] = jnp.dot(
            x_ref[...],
            p_ref[...],
            preferred_element_type=jnp.float32,
            precision=precision,
        ).astype(o_ref.dtype)
    return kernel


def _choose_tm(rows):
    """Sublane-aligned row tile: 512 for big problems, >=2 tiles when possible."""
    if rows >= 1024:
        return 512                       # ~85% of HBM roofline plateau
    if rows >= 16:
        half = (rows + 1) // 2           # split so v7x's 2nd TensorCore gets work
        return ((half + 7) // 8) * 8
    return 8                             # tiny problems: single step


def spp_layer(x, num_levels=NUM_LEVELS):
    """Equivalent of SPPLayer(num_levels).forward(x) for an NCHW input."""
    bsz, c, h, w = x.shape
    rows, hw = bsz * c, h * w
    hw_pad = ((hw + 127) // 128) * 128   # keep the lane axis (8,128)-tileable

    is_bf16 = x.dtype == jnp.bfloat16
    p_dtype = jnp.bfloat16 if is_bf16 else jnp.float32
    # f32 x f32: HIGHEST is free (HBM-bound) and makes the result near-exact.
    precision = (jax.lax.Precision.DEFAULT if is_bf16
                 else jax.lax.Precision.HIGHEST)

    p_np, sizes = _build_pooling_matrix(h, w, num_levels, hw_pad)
    L = p_np.shape[1]
    p = jnp.asarray(p_np).astype(p_dtype)

    # Lane-dense (N*C, H*W) view; zero-pad pixel axis if hw is not 128-aligned.
    x2 = x.reshape(rows, hw)
    if hw_pad > hw:
        x2 = jnp.pad(x2, ((0, 0), (0, hw_pad - hw)))

    # Row tiling with cdiv + zero-row padding (no tm=8 fallback, no single
    # giant block that could blow the scoped-VMEM default at large N*C).
    tm = _choose_tm(rows)
    grid_m = pl.cdiv(rows, tm)
    rows_pad = grid_m * tm
    if rows_pad > rows:
        x2 = jnp.pad(x2, ((0, rows_pad - rows), (0, 0)))

    x_isz = jnp.dtype(x.dtype).itemsize
    p_isz = jnp.dtype(p_dtype).itemsize
    cost = pl.CostEstimate(
        flops=2 * rows_pad * hw_pad * L,
        transcendentals=0,
        bytes_accessed=(rows_pad * hw_pad * x_isz
                        + hw_pad * L * p_isz
                        + rows_pad * L * x_isz),
    )

    pooled = pl.pallas_call(
        _make_spp_kernel(precision),
        out_shape=jax.ShapeDtypeStruct((rows_pad, L), x.dtype),
        grid=(grid_m,),
        in_specs=[
            pl.BlockSpec((tm, hw_pad), lambda m: (m, 0)),   # activation row tile
            pl.BlockSpec((hw_pad, L), lambda m: (0, 0)),    # pooling matrix
        ],
        out_specs=pl.BlockSpec((tm, L), lambda m: (m, 0)),
        compiler_params=pltpu.CompilerParams(
            dimension_semantics=("parallel",),               # megacore sharding
        ),
        cost_estimate=cost,
    )(x2, p)

    pooled = pooled[:rows]

    # Layout glue identical to torch: per level flatten (c, oh, ow), then cat.
    out3 = pooled.reshape(bsz, c, L)
    offs = np.concatenate([[0], np.cumsum(sizes)])
    parts = [
        out3[:, :, int(offs[i]):int(offs[i + 1])].reshape(bsz, -1)
        for i in range(num_levels)
    ]
    return jnp.concatenate(parts, axis=-1)


def spp_layer_reference(x, num_levels=NUM_LEVELS):
    """Plain-JAX reference (exact f32) for verification."""
    bsz, c, h, w = x.shape
    outs = []
    for i in range(num_levels):
        k, oh, ow = _level_sizes(h, w, i)
        win = x[:, :, :oh * k, :ow * k].reshape(bsz, c, oh, k, ow, k)
        outs.append(win.mean(axis=(3, 5)).reshape(bsz, -1))
    return jnp.concatenate(outs, axis=-1)


if __name__ == "__main__":
    key = jax.random.PRNGKey(0)
    # Small NCHW input consistent with the module's forward pass.
    x = jax.random.normal(key, (2, 4, 16, 16), dtype=jnp.float32)

    out = jax.block_until_ready(jax.jit(spp_layer)(x))
    ref = spp_layer_reference(x)

    assert out.shape == (2, 4 * (1 + 4 + 16)), out.shape
    # precision=HIGHEST on the f32 MXU contraction makes the result near-exact;
    # keep a modest tolerance margin for accumulation-order differences.
    assert jnp.allclose(out, ref, atol=1e-4, rtol=1e-4), "mismatch vs reference"

    print("KERNEL_OK")
</pallas_src>

<mosaic_0001>
module attributes {stable_mosaic.version = 11 : i64} {
  func.func @kernel(%arg0: i32, %arg1: memref<8x256xf32, #tpu.memory_space<vmem>>, %arg2: memref<256x21xf32, #tpu.memory_space<vmem>>, %arg3: memref<8x21xf32, #tpu.memory_space<vmem>>) attributes {dimension_semantics = [#tpu.dimension_semantics<parallel>], iteration_bounds = array<i64: 1>, scalar_prefetch = 0 : i64, scratch_operands = 0 : i64, tpu.core_type = #tpu.core_type<tc>, window_params = [{transform_indices = @transform_0, window_bounds = array<i64: 8, 256>}, {pipeline_mode = #tpu.pipeline_mode<synchronous>, transform_indices = @transform_1, window_bounds = array<i64: 256, 21>}, {transform_indices = @transform_2, window_bounds = array<i64: 8, 21>}]} {
    %c0 = arith.constant 0 : index
    %c0_0 = arith.constant 0 : index
    %0 = vector.load %arg1[%c0, %c0_0] : memref<8x256xf32, #tpu.memory_space<vmem>>, vector<8x256xf32>
    %c0_1 = arith.constant 0 : index
    %c0_2 = arith.constant 0 : index
    %1 = vector.load %arg2[%c0_1, %c0_2] : memref<256x21xf32, #tpu.memory_space<vmem>>, vector<256x21xf32>
    %cst = arith.constant dense<0.000000e+00> : vector<8x21xf32>
    %2 = tpu.matmul %0, %1, %cst {dimension_numbers = #tpu.dot_dimension_numbers<[1], [0], [0], [1], [0, 0, 1, 1], [], []>, precision = #tpu.contract_precision<fp32>} : vector<8x256xf32>, vector<256x21xf32>, vector<8x21xf32> -> vector<8x21xf32>
    %c0_3 = arith.constant 0 : index
    %c0_4 = arith.constant 0 : index
    %3 = vector.load %arg3[%c0_3, %c0_4] : memref<8x21xf32, #tpu.memory_space<vmem>>, vector<8x21xf32>
    tpu.vector_store %arg3[%c0_3, %c0_4], %2 {strides = array<i32>} : memref<8x21xf32, #tpu.memory_space<vmem>>, vector<8x21xf32>,
    return
  }
  func.func @transform_0(%arg0: i32) -> (i32, i32) {
    %c0_i32 = arith.constant 0 : i32
    %c0_i32_0 = arith.constant 0 : i32
    return %arg0, %c0_i32 : i32, i32
  }
  func.func @transform_1(%arg0: i32) -> (i32, i32) {
    %c0_i32 = arith.constant 0 : i32
    %c0_i32_0 = arith.constant 0 : i32
    %c0_i32_1 = arith.constant 0 : i32
    return %c0_i32, %c0_i32_0 : i32, i32
  }
  func.func @transform_2(%arg0: i32) -> (i32, i32) {
    %c0_i32 = arith.constant 0 : i32
    %c0_i32_0 = arith.constant 0 : i32
    return %arg0, %c0_i32 : i32, i32
  }
}

</mosaic_0001>

<bundles_post_ra>
// kernel: spp_layer.1
= control target key start
LH: loop header
LB: loop body
LE: loop exit
PB: predicated region body
PF: predicated region fallthrough
CT: control target
= control target key end

     0   :  { %7 = vsyncpa [#allocation3], 0  ;;  %s779_s12 = smov [#allocation2]   ;;  %s780_s14 = smov 128   ;;  %s1315_s0 = inlined_call_operand.vmem [shape: f32[8,256], index: 0, kind: input, shape index: {}]   ;;  %s1316_s1 = inlined_call_operand.hbm [shape: f32[256,21], index: 1, kind: input, shape index: {}]   ;;  %s1317_s2 = inlined_call_operand.vmem [shape: f32[8,21], index: 2, kind: output, shape index: {}]  }
   0x1   :  { %s14_s11 = sshll.u32 %s1316_s1, 4  ;;  %s16_s13 = sshll.u32 %s779_s12, 4  ;;  %s15_s11 = int_to_ptr.hbm [resolvable:$true] %s14_s11  ;;  %s17_s13 = int_to_ptr.vmem [resolvable:$true] %s16_s13 }
   0x2   :  { %s781_s15 = smov 8  }
   0x3   :  { %22 = dma.hbm_to_vmem [thread:$0]  %s15_s11, 4096, %s17_s13, [#allocation3], %s780_s14, %s780_s14, %s781_s15  }
   0x4   :  { %777 = dma.done.wait [#allocation3], 4096  }
   0x5   :  { %778 = vsyncadd [#allocation3], 4294963200  ;;  %v44_v0 = vld [vmem:[#allocation2 + $0x78] sm:$0xff]  ;;  %v43_v1 = vld [vmem:[#allocation2 + $0x70] sm:$0xff]  ;;  %vm743_vm0 = vcmask 171008  }
   0x6   :  { %v42_v2 = vld [vmem:[#allocation2 + $0x68] sm:$0xff]  ;;  %v800_v3 = vand.u32 4294901760, %v44_v0  ;;  %v802_v4 = vand.u32 4294901760, %v43_v1  ;;  %v41_v6 = vld [vmem:[#allocation2 + $0x60] sm:$0xff]  ;;  %v40_v7 = vld [vmem:[#allocation2 + $0x58] sm:$0xff] }
   0x7   :  { %v804_v5 = vand.u32 4294901760, %v42_v2  ;;  %v39_v8 = vld [vmem:[#allocation2 + $0x50] sm:$0xff]  ;;  %v806_v9 = vand.u32 4294901760, %v41_v6  ;;  %v808_v10 = vand.u32 4294901760, %v40_v7  ;;  %v38_v12 = vld [vmem:[#allocation2 + $0x48] sm:$0xff]  ;;  %v37_v13 = vld [vmem:[#allocation2 + $0x40] sm:$0xff] }
   0x8   :  { %v810_v11 = vand.u32 4294901760, %v39_v8  ;;  %62 = vmatpush.msra.mxu0 %v800_v3  ;;  %v814_v14 = vsub.f32 %v44_v0, %v800_v3  ;;  %v817_v15 = vsub.f32 %v43_v1, %v802_v4  ;;  %258 = vmatpush.msra.mxu3 %v800_v3  ;;  %v823_v17 = vand.u32 4294901760, %v38_v12  ;;  %v36_v18 = vld [vmem:[#allocation2 + $0x38] sm:$0xff]  ;;  %v35_v26 = vld [vmem:[#allocation2 + $0x30] sm:$0xff]  ;;  %v34_v34 = vld [vmem:[#allocation2 + $0x28] sm:$0xff] }
   0x9   :  { %v821_v16 = vsub.f32 %v42_v2, %v804_v5  ;;  %v826_v19 = vsub.f32 %v41_v6, %v806_v9  ;;  %v829_v20 = vsub.f32 %v40_v7, %v808_v10  ;;  %v839_v25 = vand.u32 4294901760, %v37_v13  ;;  %v33_v42 = vld [vmem:[#allocation2 + $0x20] sm:$0xff]  ;;  %v32_v48 = vld [vmem:[#allocation2 + $0x18] sm:$0xff]  ;;  %v31_v54 = vld [vmem:[#allocation2 + $0x10] sm:$0xff] }
   0xa   :  { %v832_v21 = vsub.f32 %v39_v8, %v810_v11  ;;  %64 = vmatpush.msra.mxu0 %v802_v4  ;;  %205 = vmatpush.msra.mxu2 %v814_v14  ;;  %v104_v22 = vand.u32 4294901760, %v814_v14  ;;  %v1333_v23 = vand.u32 4294901760, %v817_v15  ;;  %v843_v28 = vand.u32 4294901760, %v36_v18  ;;  %v60_v59 = vld [vmem:[#allocation2 + $0xf8] sm:$0xff]  ;;  %v30_v61 = vld [vmem:[#allocation2 + $0x8] sm:$0xff]  ;;  %v29_v2 = vld [vmem:[#allocation2] sm:$0xff] }
   0xb   :  { %v1331_v24 = vand.u32 4294901760, %v821_v16  ;;  %260 = vmatpush.msra.mxu3 %v802_v4  ;;  %v1329_v27 = vand.u32 4294901760, %v826_v19  ;;  %v846_v29 = vsub.f32 %v38_v12, %v823_v17  ;;  %v1327_v33 = vand.u32 4294901760, %v829_v20  ;;  %v59_v6 = vld [vmem:[#allocation2 + $0xf0] sm:$0xff] }
   0xc   :  { %66 = vmatpush.msra.mxu0 %v804_v5  ;;  %208 = vmatpush.msra.mxu2 %v817_v15  ;;  %v105_v30 = vsub.f32 %v814_v14, %v104_v22  ;;  %v111_v31 = vsub.f32 %v817_v15, %v1333_v23  ;;  %v861_v35 = vand.u32 4294901760, %v35_v26  ;;  %v1325_v36 = vand.u32 4294901760, %v832_v21 }
   0xd   :  { %v117_v32 = vsub.f32 %v821_v16, %v1331_v24  ;;  %262 = vmatpush.msra.mxu3 %v804_v5  ;;  %v123_v39 = vsub.f32 %v826_v19, %v1329_v27  ;;  %v870_v40 = vsub.f32 %v37_v13, %v839_v25  ;;  %v873_v41 = vand.u32 4294901760, %v34_v34 }
   0xe   :  { %68 = vmatpush.msra.mxu0 %v806_v9  ;;  %v106_v37 = vand.u32 4294901760, %v105_v30  ;;  %211 = vmatpush.msra.mxu2 %v821_v16  ;;  %v112_v38 = vand.u32 4294901760, %v111_v31  ;;  %v129_v44 = vsub.f32 %v829_v20, %v1327_v33  ;;  %v1324_v45 = vand.u32 4294901760, %v846_v29 }
   0xf   :  { %264 = vmatpush.msra.mxu3 %v806_v9  ;;  %v118_v43 = vand.u32 4294901760, %v117_v32  ;;  %v881_v46 = vsub.f32 %v36_v18, %v843_v28  ;;  %v135_v47 = vsub.f32 %v832_v21, %v1325_v36  ;;  %v124_v49 = vand.u32 4294901760, %v123_v39  ;;  %v58_v32 = vld [vmem:[#allocation2 + $0xe8] sm:$0xff] }
  0x10   :  { %70 = vmatpush.msra.mxu0 %v808_v10  ;;  %107 = vmatpush.msra.mxu1 %v106_v37  ;;  %v889_v50 = vand.u32 4294901760, %v33_v42  ;;  %v1323_v51 = vand.u32 4294901760, %v870_v40  ;;  %v893_v52 = vsub.f32 %v35_v26, %v861_v35  ;;  %v898_v53 = vsub.f32 %v34_v34, %v873_v41 }
  0x11   :  { %214 = vmatpush.msra.mxu2 %v826_v19  ;;  %266 = vmatpush.msra.mxu3 %v808_v10  ;;  %v130_v55 = vand.u32 4294901760, %v129_v44  ;;  %v141_v56 = vsub.f32 %v846_v29, %v1324_v45  ;;  %v904_v57 = vand.u32 4294901760, %v32_v48  ;;  %v1322_v58 = vand.u32 4294901760, %v881_v46  ;;  %v57_v44 = vld [vmem:[#allocation2 + $0xe0] sm:$0xff] }
  0x12   :  { %72 = vmatpush.msra.mxu0 %v810_v11  ;;  %113 = vmatpush.msra.mxu1 %v112_v38  ;;  %v136_v60 = vand.u32 4294901760, %v135_v47  ;;  %v147_v62 = vsub.f32 %v870_v40, %v1323_v51  ;;  %v913_v63 = vand.u32 4294901760, %v31_v54  ;;  %v1320_v0 = vand.u32 4294901760, %v893_v52  ;;  %v53_v45 = vld [vmem:[#allocation2 + $0xc0] sm:$0xff] }
  0x13   :  { %217 = vmatpush.msra.mxu2 %v829_v20  ;;  %268 = vmatpush.msra.mxu3 %v810_v11  ;;  %v917_v1 = vsub.f32 %v33_v42, %v889_v50  ;;  %v1319_v7 = vand.u32 4294901760, %v898_v53  ;;  %v922_v8 = vand.u32 4294901760, %v60_v59  ;;  %v142_v12 = vand.u32 4294901760, %v141_v56 }
  0x14   :  { %74 = vmatpush.msra.mxu0 %v823_v17  ;;  %119 = vmatpush.msra.mxu1 %v118_v43  ;;  %v153_v13 = vsub.f32 %v881_v46, %v1322_v58  ;;  %v928_v18 = vand.u32 4294901760, %v30_v61  ;;  %v931_v26 = vsub.f32 %v32_v48, %v904_v57  ;;  %v935_v30 = vand.u32 4294901760, %v29_v2 }
  0x15   :  { %220 = vmatpush.msra.mxu2 %v832_v21  ;;  %270 = vmatpush.msra.mxu3 %v823_v17  ;;  %v937_v31 = vand.u32 4294901760, %v59_v6  ;;  %v148_v34 = vand.u32 4294901760, %v147_v62  ;;  %v159_v37 = vsub.f32 %v893_v52, %v1320_v0  ;;  %v1318_v38 = vand.u32 4294901760, %v917_v1 }
  0x16   :  { %76 = vmatpush.msra.mxu0 %v839_v25  ;;  %125 = vmatpush.msra.mxu1 %v124_v49  ;;  %1338 = vst [vmem:[#allocation5_spill] sm:$0xff] %v935_v30  ;;  %v945_v39 = vsub.f32 %v31_v54, %v913_v63  ;;  %v165_v42 = vsub.f32 %v898_v53, %v1319_v7  ;;  %v154_v47 = vand.u32 4294901760, %v153_v13  ;;  %v1321_v48 = vand.u32 4294901760, %v931_v26  ;;  %v55_v13 = vld [vmem:[#allocation2 + $0xd0] sm:$0xff] }
  0x17   :  { %223 = vmatpush.msra.mxu2 %v846_v29  ;;  %272 = vmatpush.msra.mxu3 %v839_v25  ;;  %v953_v43 = vsub.f32 %v60_v59, %v922_v8  ;;  %v958_v49 = vsub.f32 %v30_v61, %v928_v18  ;;  %v960_v54 = vand.u32 4294901760, %v58_v32  ;;  %v968_v56 = vsub.f32 %v59_v6, %v937_v31  ;;  %v56_v59 = vld [vmem:[#allocation2 + $0xd8] sm:$0xff] }
  0x18   :  { %78 = vmatpush.msra.mxu0 %v843_v28  ;;  %131 = vmatpush.msra.mxu1 %v130_v55  ;;  %v965_v55 = vsub.f32 %v29_v2, %v935_v30  ;;  %v171_v61 = vsub.f32 %v917_v1, %v1318_v38  ;;  %v1326_v62 = vand.u32 4294901760, %v945_v39  ;;  %v166_v2 = vand.u32 4294901760, %v165_v42  ;;  %v54_v42 = vld [vmem:[#allocation2 + $0xc8] sm:$0xff] }
  0x19   :  { %226 = vmatpush.msra.mxu2 %v870_v40  ;;  %274 = vmatpush.msra.mxu3 %v843_v28  ;;  %v1328_v6 = vand.u32 4294901760, %v953_v43  ;;  %v986_v38 = vsub.f32 %v58_v32, %v960_v54  ;;  %v988_v7 = vand.u32 4294901760, %v56_v59  ;;  %v1001_v51 = vand.u32 4294901760, %v55_v13 }
  0x1a   :  { %80 = vmatpush.msra.mxu0 %v861_v35  ;;  %137 = vmatpush.msra.mxu1 %v136_v60  ;;  %v160_v60 = vand.u32 4294901760, %v159_v37  ;;  %v1330_v37 = vand.u32 4294901760, %v958_v49  ;;  %v1334_v0 = vand.u32 4294901760, %v965_v55  ;;  %v183_v32 = vsub.f32 %v945_v39, %v1326_v62 }
  0x1b   :  { %229 = vmatpush.msra.mxu2 %v881_v46  ;;  %276 = vmatpush.msra.mxu3 %v861_v35  ;;  %v446_v36 = vsub.f32 %v953_v43, %v1328_v6  ;;  %v1335_v62 = vand.u32 4294901760, %v986_v38  ;;  %v1016_v33 = vsub.f32 %v56_v59, %v988_v7  ;;  %v1023_v27 = vand.u32 4294901760, %v53_v45 }
  0x1c   :  { %82 = vmatpush.msra.mxu0 %v873_v41  ;;  %143 = vmatpush.msra.mxu1 %v142_v12  ;;  %v975_v12 = vand.u32 4294901760, %v57_v44  ;;  %v195_v59 = vsub.f32 %v965_v55, %v1334_v0  ;;  %v1031_v24 = vsub.f32 %v55_v13, %v1001_v51  ;;  %v1339_v14 = vand.u32 4294901760, %v817_v15 }
  0x1d   :  { %232 = vmatpush.msra.mxu2 %v893_v52  ;;  %278 = vmatpush.msra.mxu3 %v873_v41  ;;  %v458_v0 = vsub.f32 %v986_v38, %v1335_v62  ;;  %v1341_v15 = vand.u32 4294901760, %v821_v16  ;;  %v1343_v16 = vand.u32 4294901760, %v826_v19  ;;  %v1345_v19 = vand.u32 4294901760, %v829_v20 }
  0x1e   :  { %84 = vmatpush.msra.mxu0 %v889_v50  ;;  %149 = vmatpush.msra.mxu1 %v148_v34  ;;  %v177_v34 = vsub.f32 %v931_v26, %v1321_v48  ;;  %v172_v48 = vand.u32 4294901760, %v171_v61  ;;  %v999_v58 = vsub.f32 %v57_v44, %v975_v12  ;;  %v189_v44 = vsub.f32 %v958_v49, %v1330_v37 }
  0x1f   :  { %235 = vmatpush.msra.mxu2 %v898_v53  ;;  %280 = vmatpush.msra.mxu3 %v889_v50 }
  0x20   :  { %86 = vmatpush.msra.mxu0 %v904_v57  ;;  %155 = vmatpush.msra.mxu1 %v154_v47  ;;  %v1332_v47 = vand.u32 4294901760, %v968_v56  ;;  %v178_v61 = vand.u32 4294901760, %v177_v34  ;;  %v184_v34 = vand.u32 4294901760, %v183_v32  ;;  %v190_v32 = vand.u32 4294901760, %v189_v44 }
  0x21   :  { %238 = vmatpush.msra.mxu2 %v917_v1  ;;  %282 = vmatpush.msra.mxu3 %v904_v57  ;;  %v1340_v44 = vand.u32 4294901760, %v999_v58 }
  0x22   :  { %88 = vmatpush.msra.mxu0 %v913_v63  ;;  %161 = vmatpush.msra.mxu1 %v160_v60  ;;  %v1008_v60 = vand.u32 4294901760, %v54_v42  ;;  %v452_v6 = vsub.f32 %v968_v56, %v1332_v47  ;;  %v447_v47 = vand.u32 4294901760, %v446_v36  ;;  %v1050_v36 = vsub.f32 %v53_v45, %v1023_v27 }
  0x23   :  { %241 = vmatpush.msra.mxu2 %v931_v26  ;;  %284 = vmatpush.msra.mxu3 %v913_v63  ;;  %v464_v62 = vsub.f32 %v999_v58, %v1340_v44 }
  0x24   :  { %90 = vmatpush.msra.mxu0 %v928_v18  ;;  %167 = vmatpush.msra.mxu1 %v166_v2  ;;  %v52_v2 = vld [vmem:[#allocation2 + $0xb8] sm:$0xff]  ;;  %v1037_v23 = vsub.f32 %v54_v42, %v1008_v60  ;;  %v50_v42 = vld [vmem:[#allocation2 + $0xa8] sm:$0xff] }
  0x25   :  { %244 = vmatpush.msra.mxu2 %v945_v39  ;;  %286 = vmatpush.msra.mxu3 %v928_v18  ;;  %v1044_v37 = vand.u32 4294901760, %v52_v2  ;;  %v1069_v13 = vand.u32 4294901760, %v50_v42 }
  0x26   :  { %92 = vmatpush.msra.mxu0 %v935_v30  ;;  %173 = vmatpush.msra.mxu1 %v172_v48  ;;  %v51_v48 = vld [vmem:[#allocation2 + $0xb0] sm:$0xff] }
  0x27   :  { %247 = vmatpush.msra.mxu2 %v958_v49  ;;  %288 = vmatpush.msra.mxu3 %v935_v30  ;;  %v1057_v30 = vand.u32 4294901760, %v51_v48  ;;  %v1067_v44 = vsub.f32 %v52_v2, %v1044_v37 }
  0x28   :  { %299 = vmatpush.msrb.mxu0 %v104_v22  ;;  %179 = vmatpush.msra.mxu1 %v178_v61  ;;  %v453_v22 = vand.u32 4294901760, %v452_v6  ;;  %v196_v61 = vand.u32 4294901760, %v195_v59  ;;  %v49_v6 = vld [vmem:[#allocation2 + $0xa0] sm:$0xff]  ;;  %v1342_v59 = vand.u32 4294901760, %v1016_v33 }
  0x29   :  { %250 = vmatpush.msra.mxu2 %v965_v55  ;;  %448 = vmatpush.msrb.mxu3 %v447_v47  ;;  %v1337_v47 = vand.u32 4294901760, %v1050_v36  ;;  %v1079_v2 = vsub.f32 %v51_v48, %v1057_v30  ;;  %v1081_v45 = vand.u32 4294901760, %v49_v6 }
  0x2a   :  { %303 = vmatpush.msrb.mxu0 %v1339_v14  ;;  %185 = vmatpush.msra.mxu1 %v184_v34  ;;  %v459_v34 = vand.u32 4294901760, %v458_v0  ;;  %v470_v14 = vsub.f32 %v1016_v33, %v1342_v59  ;;  %v465_v0 = vand.u32 4294901760, %v464_v62  ;;  %v27_v62 = vld [vmem:[%s1315_s0] sm:$0xff] }
  0x2b   :  { %403 = vmatpush.msrb.mxu2 %v922_v8  ;;  %454 = vmatpush.msrb.mxu3 %v453_v22  ;;  %v1346_v22 = vand.u32 4294901760, %v1037_v23 }
  0x2c   :  { %307 = vmatpush.msrb.mxu0 %v1341_v15  ;;  %191 = vmatpush.msra.mxu1 %v190_v32  ;;  %v48_v15 = vld [vmem:[#allocation2 + $0x98] sm:$0xff]  ;;  %v1344_v32 = vand.u32 4294901760, %v1031_v24  ;;  %v471_v48 = vand.u32 4294901760, %v470_v14 }
  0x2d   :  { %405 = vmatpush.msrb.mxu2 %v937_v31  ;;  %460 = vmatpush.msrb.mxu3 %v459_v34  ;;  %v1097_v20 = vand.u32 4294901760, %v48_v15 }
  0x2e   :  { %311 = vmatpush.msrb.mxu0 %v1343_v16  ;;  %197 = vmatpush.msra.mxu1 %v196_v61  ;;  %v476_v59 = vsub.f32 %v1031_v24, %v1344_v32  ;;  %v482_v61 = vsub.f32 %v1037_v23, %v1346_v22  ;;  %v1095_v32 = vsub.f32 %v50_v42, %v1069_v13  ;;  %v47_v22 = vld [vmem:[#allocation2 + $0x90] sm:$0xff]  ;;  %v1110_v16 = vand.u32 4294901760, %v27_v62 }
  0x2f   :  { %407 = vmatpush.msrb.mxu2 %v960_v54  ;;  %466 = vmatpush.msrb.mxu3 %v465_v0  ;;  %v1108_v42 = vsub.f32 %v49_v6, %v1081_v45  ;;  %v1349_v0 = vand.u32 4294901760, %v1067_v44  ;;  %v1120_v6 = vand.u32 4294901760, %v47_v22  ;;  %v1123_v14 = vsub.f32 %v48_v15, %v1097_v20 }
  0x30   :  { %315 = vmatpush.msrb.mxu0 %v1345_v19  ;;  %366 = vmatpush.msrb.mxu1 %v800_v3  ;;  %v1347_v3 = vand.u32 4294901760, %v832_v21  ;;  %v488_v19 = vsub.f32 %v1050_v36, %v1337_v47  ;;  %v477_v34 = vand.u32 4294901760, %v476_v59  ;;  %v1348_v21 = vand.u32 4294901760, %v846_v29  ;;  %v45_v47 = vld [vmem:[#allocation2 + $0x80] sm:$0xff] }
  0x31   :  { %409 = vmatpush.msrb.mxu2 %v975_v12  ;;  %472 = vmatpush.msrb.mxu3 %v471_v48  ;;  %v494_v59 = vsub.f32 %v1067_v44, %v1349_v0  ;;  %v1350_v29 = vand.u32 4294901760, %v870_v40  ;;  %v1134_v0 = vsub.f32 %v27_v62, %v1110_v16  ;;  %v1352_v40 = vand.u32 4294901760, %v881_v46 }
  0x32   :  { %319 = vmatpush.msrb.mxu0 %v1347_v3  ;;  %368 = vmatpush.msrb.mxu1 %v802_v4  ;;  %v483_v4 = vand.u32 4294901760, %v482_v61  ;;  %v46_v3 = vld [vmem:[#allocation2 + $0x88] sm:$0xff]  ;;  %v1351_v61 = vand.u32 4294901760, %v1079_v2  ;;  %v1147_v62 = vsub.f32 %v47_v22, %v1120_v6  ;;  %v1152_v46 = vand.u32 4294901760, %v45_v47 }
  0x33   :  { %411 = vmatpush.msrb.mxu2 %v988_v7  ;;  %478 = vmatpush.msrb.mxu3 %v477_v34  ;;  %v1136_v15 = vand.u32 4294901760, %v46_v3 }
  0x34   :  { %323 = vmatpush.msrb.mxu0 %v1348_v21  ;;  %370 = vmatpush.msrb.mxu1 %v804_v5  ;;  %v489_v5 = vand.u32 4294901760, %v488_v19  ;;  %v500_v48 = vsub.f32 %v1079_v2, %v1351_v61  ;;  %v511_v21 = vand.u32 4294901760, %v1108_v42  ;;  %v1353_v19 = vand.u32 4294901760, %v1095_v32 }
  0x35   :  { %413 = vmatpush.msrb.mxu2 %v1001_v51  ;;  %484 = vmatpush.msrb.mxu3 %v483_v4  ;;  %v1354_v61 = vand.u32 4294901760, %v893_v52  ;;  %v1160_v22 = vsub.f32 %v46_v3, %v1136_v15  ;;  %v1355_v52 = vand.u32 4294901760, %v898_v53  ;;  %v523_v3 = vand.u32 4294901760, %v1147_v62 }
  0x36   :  { %327 = vmatpush.msrb.mxu0 %v1350_v29  ;;  %372 = vmatpush.msrb.mxu1 %v806_v9  ;;  %v495_v9 = vand.u32 4294901760, %v494_v59  ;;  %v506_v34 = vsub.f32 %v1095_v32, %v1353_v19  ;;  %v517_v29 = vand.u32 4294901760, %v1123_v14  ;;  %v512_v4 = vsub.f32 %v1108_v42, %v511_v21 }
  0x37   :  { %415 = vmatpush.msrb.mxu2 %v1008_v60  ;;  %490 = vmatpush.msrb.mxu3 %v489_v5  ;;  %v95_v59 = vand.u32 4294901760, %v1134_v0  ;;  %v529_v19 = vand.u32 4294901760, %v1160_v22 }
  0x38   :  { %331 = vmatpush.msrb.mxu0 %v1352_v40  ;;  %374 = vmatpush.msrb.mxu1 %v808_v10  ;;  %v501_v10 = vand.u32 4294901760, %v500_v48  ;;  %v507_v5 = vand.u32 4294901760, %v506_v34  ;;  %v518_v48 = vsub.f32 %v1123_v14, %v517_v29  ;;  %v1356_v40 = vand.u32 4294901760, %v917_v1 }
  0x39   :  { %417 = vmatpush.msrb.mxu2 %v1023_v27  ;;  %496 = vmatpush.msrb.mxu3 %v495_v9  ;;  %v513_v53 = vand.u32 4294901760, %v512_v4  ;;  %v96_v9 = vsub.f32 %v1134_v0, %v95_v59  ;;  %v524_v1 = vsub.f32 %v1147_v62, %v523_v3 }
  0x3a   :  { %335 = vmatpush.msrb.mxu0 %v1354_v61  ;;  %376 = vmatpush.msrb.mxu1 %v810_v11  ;;  %v28_v11 = vld [vmem:[%s1315_s0 + $0x8] sm:$0xff]  ;;  %v1357_v61 = vand.u32 4294901760, %v931_v26 }
  0x3b   :  { %419 = vmatpush.msrb.mxu2 %v1044_v37  ;;  %502 = vmatpush.msrb.mxu3 %v501_v10  ;;  %v1182_v34 = vand.u32 4294901760, %v28_v11  ;;  %v97_v26 = vand.u32 4294901760, %v96_v9 }
  0x3c   :  { %339 = vmatpush.msrb.mxu0 %v1355_v52  ;;  %378 = vmatpush.msrb.mxu1 %v823_v17  ;;  %v1177_v17 = vsub.f32 %v45_v47, %v1152_v46  ;;  %v1358_v47 = vand.u32 4294901760, %v945_v39  ;;  %v1359_v52 = vand.u32 4294901760, %v958_v49  ;;  %v1360_v39 = vand.u32 4294901760, %v965_v55 }
  0x3d   :  { %421 = vmatpush.msrb.mxu2 %v1057_v30  ;;  %508 = vmatpush.msrb.mxu3 %v507_v5  ;;  %v1200_v4 = vsub.f32 %v28_v11, %v1182_v34 }
  0x3e   :  { %343 = vmatpush.msrb.mxu0 %v1356_v40  ;;  %380 = vmatpush.msrb.mxu1 %v839_v25  ;;  %v519_v25 = vand.u32 4294901760, %v518_v48  ;;  %v535_v10 = vand.u32 4294901760, %v1177_v17 }
  0x3f   :  { %423 = vmatpush.msrb.mxu2 %v1069_v13  ;;  %514 = vmatpush.msrb.mxu3 %v513_v53  ;;  %v436_v11 = vand.u32 4294901760, %v1200_v4 }
  0x40   :  { %347 = vmatpush.msrb.mxu0 %v1357_v61  ;;  %382 = vmatpush.msrb.mxu1 %v843_v28  ;;  %v530_v28 = vsub.f32 %v1160_v22, %v529_v19  ;;  %v536_v5 = vsub.f32 %v1177_v17, %v535_v10 }
  0x41   :  { %425 = vmatpush.msrb.mxu2 %v1081_v45  ;;  %520 = vmatpush.msrb.mxu3 %v519_v25 }
  0x42   :  { %351 = vmatpush.msrb.mxu0 %v1358_v47  ;;  %384 = vmatpush.msrb.mxu1 %v861_v35  ;;  %v525_v35 = vand.u32 4294901760, %v524_v1  ;;  %v531_v49 = vand.u32 4294901760, %v530_v28 }
  0x43   :  { %427 = vmatpush.msrb.mxu2 %v1097_v20  ;;  %98 = vmatmul.f32.vlgmr.msra.gmra.mxu0 %v97_v26 }
  0x44   :  { %355 = vmatpush.msrb.mxu0 %v1359_v52  ;;  %386 = vmatpush.msrb.mxu1 %v873_v41  ;;  %v537_v41 = vand.u32 4294901760, %v536_v5 }
  0x45   :  { %429 = vmatpush.msrb.mxu2 %v1120_v6  ;;  %526 = vmatpush.msrb.mxu3 %v525_v35 }
  0x46   :  { %359 = vmatpush.msrb.mxu0 %v1360_v39  ;;  %388 = vmatpush.msrb.mxu1 %v889_v50  ;;  %v437_v50 = vsub.f32 %v1200_v4, %v436_v11 }
  0x47   :  { %431 = vmatpush.msrb.mxu2 %v1136_v15  ;;  %532 = vmatpush.msrb.mxu3 %v531_v49 }
  0x48   :  { %546 = vmatpush.msra.mxu0 %v953_v43  ;;  %390 = vmatpush.msrb.mxu1 %v904_v57  ;;  %v1361_v57 = vand.u32 4294901760, %v953_v43  ;;  %v438_v55 = vand.u32 4294901760, %v437_v50  ;;  %v1364_v43 = vand.u32 4294901760, %v986_v38 }
  0x49   :  { %253 = vmatmul.f32.vlgmr.msra.gmra.mxu2 %v1134_v0  ;;  %292 = vmatmul.f32.vlgmr.msra.gmra.mxu3 %v95_v59  ;;  %v1363_v0 = vld [vmem:[#allocation5_spill] sm:$0xff] }
  0x4a   :  { %549 = vmatpush.msra.mxu0 %v968_v56  ;;  %392 = vmatpush.msrb.mxu1 %v913_v63  ;;  %v1362_v63 = vand.u32 4294901760, %v968_v56 }
  0x4b   :  { %433 = vmatpush.msrb.mxu2 %v1152_v46  ;;  %538 = vmatpush.msrb.mxu3 %v537_v41 }
  0x4c   :  { %552 = vmatpush.msra.mxu0 %v986_v38  ;;  %394 = vmatpush.msrb.mxu1 %v928_v18  ;;  %v1365_v18 = vand.u32 4294901760, %v999_v58 }
  0x4d   :  { %640 = vmatpush.msra.mxu2 %v1361_v57  ;;  %199 = vmatmul.f32.vlgmr.msra.gmra.mxu1 %v1110_v16 }
  0x4e   :  { %555 = vmatpush.msra.mxu0 %v999_v58  ;;  %707 = vmatpush.msra.mxu3 %v922_v8  ;;  %v1367_v58 = vand.u32 4294901760, %v1031_v24 }
  0x4f   :  { %644 = vmatpush.msra.mxu2 %v1362_v63  ;;  %396 = vmatpush.msrb.mxu1 %v1363_v0 }
  0x50   :  { %558 = vmatpush.msra.mxu0 %v1016_v33  ;;  %709 = vmatpush.msra.mxu3 %v937_v31 }
  0x51   :  { %599 = vmatpush.msra.mxu1 %v922_v8  ;;  %648 = vmatpush.msra.mxu2 %v1364_v43  ;;  %v1366_v8 = vand.u32 4294901760, %v1016_v33  ;;  %v1368_v33 = vand.u32 4294901760, %v1037_v23 }
  0x52   :  { %439 = vmatmul.f32.vlgmr.msrb.gmra.mxu2 %v438_v55  ;;  %561 = vmatpush.msra.mxu0 %v1031_v24  ;;  %v1370_v24 = vand.u32 4294901760, %v1067_v44 }
  0x53   :  { %601 = vmatpush.msra.mxu1 %v937_v31  ;;  %652 = vmatpush.msra.mxu2 %v1365_v18  ;;  %v1369_v31 = vand.u32 4294901760, %v1050_v36 }
  0x54   :  { %711 = vmatpush.msra.mxu3 %v960_v54  ;;  %361 = vmatmul.f32.vlgmr.msrb.gmra.mxu0 %v1110_v16 }
  0x55   :  { %540 = vmatmul.f32.vlgmr.msrb.gmra.mxu3 %v1182_v34  ;;  %564 = vmatpush.msra.mxu0 %v1037_v23  ;;  %v1371_v23 = vand.u32 4294901760, %v1079_v2 }
  0x56   :  { %603 = vmatpush.msra.mxu1 %v960_v54  ;;  %656 = vmatpush.msra.mxu2 %v1366_v8 }
  0x57   :  { %713 = vmatpush.msra.mxu3 %v975_v12  ;;  %398 = vmatmul.f32.vlgmr.msrb.gmra.mxu1 %v1110_v16 }
  0x58   :  { %567 = vmatpush.msra.mxu0 %v1050_v36  ;;  %605 = vmatpush.msra.mxu1 %v975_v12 }
  0x59   :  { %660 = vmatpush.msra.mxu2 %v1367_v58  ;;  %715 = vmatpush.msra.mxu3 %v988_v7 }
  0x5a   :  { %570 = vmatpush.msra.mxu0 %v1067_v44  ;;  %607 = vmatpush.msra.mxu1 %v988_v7 }
  0x5b   :  { %664 = vmatpush.msra.mxu2 %v1368_v33  ;;  %717 = vmatpush.msra.mxu3 %v1001_v51 }
  0x5c   :  { %573 = vmatpush.msra.mxu0 %v1079_v2  ;;  %609 = vmatpush.msra.mxu1 %v1001_v51  ;;  %v1372_v51 = vand.u32 4294901760, %v1095_v32 }
  0x5d   :  { %668 = vmatpush.msra.mxu2 %v1369_v31  ;;  %719 = vmatpush.msra.mxu3 %v1008_v60 }
  0x5e   :  { %576 = vmatpush.msra.mxu0 %v1095_v32  ;;  %611 = vmatpush.msra.mxu1 %v1008_v60 }
  0x5f   :  { %672 = vmatpush.msra.mxu2 %v1370_v24  ;;  %721 = vmatpush.msra.mxu3 %v1023_v27 }
  0x60   :  { %579 = vmatpush.msra.mxu0 %v1108_v42  ;;  %613 = vmatpush.msra.mxu1 %v1023_v27 }
  0x61   :  { %676 = vmatpush.msra.mxu2 %v1371_v23  ;;  %723 = vmatpush.msra.mxu3 %v1044_v37 }
  0x62   :  { %582 = vmatpush.msra.mxu0 %v1123_v14  ;;  %615 = vmatpush.msra.mxu1 %v1044_v37 }
  0x63   :  { %680 = vmatpush.msra.mxu2 %v1372_v51  ;;  %725 = vmatpush.msra.mxu3 %v1057_v30 }
  0x64   :  { %585 = vmatpush.msra.mxu0 %v1147_v62  ;;  %617 = vmatpush.msra.mxu1 %v1057_v30 }
  0x65   :  { %684 = vmatpush.msra.mxu2 %v511_v21  ;;  %727 = vmatpush.msra.mxu3 %v1069_v13 }
  0x66   :  { %588 = vmatpush.msra.mxu0 %v1160_v22  ;;  %619 = vmatpush.msra.mxu1 %v1069_v13 }
  0x67   :  { %688 = vmatpush.msra.mxu2 %v517_v29  ;;  %729 = vmatpush.msra.mxu3 %v1081_v45 }
  0x68   :  { %591 = vmatpush.msra.mxu0 %v1177_v17  ;;  %621 = vmatpush.msra.mxu1 %v1081_v45 }
  0x69   :  { %692 = vmatpush.msra.mxu2 %v523_v3  ;;  %731 = vmatpush.msra.mxu3 %v1097_v20 }
  0x6a   :  { %594 = vmatmul.f32.vlgmr.msra.gmra.mxu0 %v1200_v4  ;;  %623 = vmatpush.msra.mxu1 %v1097_v20 }
  0x6b   :  { %696 = vmatpush.msra.mxu2 %v529_v19  ;;  %733 = vmatpush.msra.mxu3 %v1120_v6 }
  0x6c   :  { %625 = vmatpush.msra.mxu1 %v1120_v6 }
  0x6d   :  { %700 = vmatpush.msra.mxu2 %v535_v10  ;;  %735 = vmatpush.msra.mxu3 %v1136_v15 }
  0x6e   :  { %702 = vmatmul.f32.vlgmr.msra.gmra.mxu2 %v1182_v34  ;;  %627 = vmatpush.msra.mxu1 %v1136_v15 }
  0x6f   :  { %737 = vmatpush.msra.mxu3 %v1152_v46 }
  0x70   :  { %739 = vmatmul.f32.vlgmr.msra.gmra.mxu3 %v1182_v34  ;;  %629 = vmatpush.msra.mxu1 %v1152_v46 }
  0x71   :  { %633 = vmatmul.f32.vlgmr.msra.gmra.mxu1 %v436_v11 }
  0xc0   :  { %v99_v7 = vpop.f32.mrf.mxu0 }
  0xca   :  { %v200_v27 = vpop.f32.mrf.mxu1 }
  0xcb   :  { %v201_v30 = vadd.f32 %v200_v27, %v99_v7 }
  0xcc   :  { %v254_v38 = vpop.f32.mrf.mxu2  ;;  %v293_v56 = vpop.f32.mrf.mxu3 }
  0xcd   :  { %v255_v54 = vadd.f32 %v254_v38, %v201_v30 }
  0xcf   :  { %v294_v12 = vadd.f32 %v293_v56, %v255_v54 }
  0xd1   :  { %v362_v37 = vpop.f32.mrf.mxu0 }
  0xd2   :  { %v363_v60 = vadd.f32 %v362_v37, %v294_v12 }
  0xd4   :  { %v399_v13 = vpop.f32.mrf.mxu1 }
  0xd5   :  { %v400_v36 = vadd.f32 %v399_v13, %v363_v60  ;;  %v440_v45 = vpop.f32.mrf.mxu2 }
  0xd7   :  { %v441_v44 = vadd.f32 %v440_v45, %v400_v36 }
  0xd8   :  { %v541_v2 = vpop.f32.mrf.mxu3 }
  0xd9   :  { %v542_v32 = vadd.f32 %v541_v2, %v441_v44 }
  0xe7   :  { %v595_v16 = vpop.f32.mrf.mxu0 }
  0xe8   :  { %v596_v20 = vadd.f32 %v595_v16, %v542_v32 }
  0xee   :  { %v634_v14 = vpop.f32.mrf.mxu1 }
  0xef   :  { %v635_v42 = vadd.f32 %v634_v14, %v596_v20 }
  0xf1   :  { %v703_v6 = vpop.f32.mrf.mxu2 }
  0xf2   :  { %v704_v21 = vadd.f32 %v703_v6, %v635_v42 }
  0xf3   :  { %v740_v15 = vpop.f32.mrf.mxu3 }
  0xf4   :  { %v741_v29 = vadd.f32 %v740_v15, %v704_v21 }
  0xf6   :  { %744 = vst.msk [vmem:[%s1317_s2] sm:$0xff] %vm743_vm0, %v741_v29 }
  0xf7   :  { %749 = vsyncpa [#allocation3], 1 }

</bundles_post_ra>
